<compile_context>
chip_gen: v6e
topology: v6e:2x2x1
jax: 0.10.0
libtpu: 0.0.40
codegen_flags: <defaults>
</compile_context>

<pallas_src>
import functools

import jax
import jax.numpy as jnp
from jax.experimental import pallas as pl
from jax.experimental.pallas import tpu as pltpu

HIDDEN = 256
OUT_SUBLANES = 8    # minimum f32 sublane tile; only sublane 0 is meaningful
_MIN_TILE = 256     # batches <= 2*this run as a single full-batch tile


def _round_up(x, m):
    return ((x + m - 1) // m) * m


def _q_mlp_kernel(x_ref, w1_ref, b1_ref, w2_ref, b2_ref, w3_ref, b3_ref, o_ref):
    # bf16 operands for the MXU, f32 accumulate; epilogue stays f32
    # (v5e has no bf16 VPU/EUP).
    x_bf = x_ref[...].astype(jnp.bfloat16)

    h1 = jnp.dot(x_bf, w1_ref[...], preferred_element_type=jnp.float32) + b1_ref[...]
    h1 = jnp.maximum(h1, 0.0)

    h2 = jnp.dot(h1.astype(jnp.bfloat16), w2_ref[...],
                 preferred_element_type=jnp.float32) + b2_ref[...]
    h2 = jnp.maximum(h2, 0.0)

    # fc3 (N=1): VPU multiply + lane reduction (no MXU pass) -> [TB, 1], then a
    # small XLU transpose so the batch lands on lanes (lane-major [1, TB]).
    q_col = jnp.sum(h2 * w3_ref[...], axis=-1, keepdims=True)          # [TB, 1]
    q_row = jnp.transpose(q_col) + b3_ref[...]                          # [1, TB]

    # Store a (1, 8, TB) slab replicated over the 8 minimum f32 sublanes;
    # the wrapper reads sublane 0.  For tiny batches (TB < 128) the last-dim
    # block equals the full array dim, so stores are masked -- harmless there.
    o_ref[...] = jnp.broadcast_to(q_row[None], o_ref.shape).astype(o_ref.dtype)


def init_params(key, state_dim, action_dim):
    """f32 master params mirroring nn.Linear's U(-1/sqrt(fan_in), ...) init.

    Weights stored as [in_features, out_features] (transpose of PyTorch)."""
    in_dim = state_dim * 4 + action_dim
    dims = [(in_dim, HIDDEN), (HIDDEN, HIDDEN), (HIDDEN, 1)]
    params = []
    for i, (fan_in, fan_out) in enumerate(dims):
        kw, kb = jax.random.split(jax.random.fold_in(key, i))
        bound = 1.0 / (fan_in ** 0.5)
        w = jax.random.uniform(kw, (fan_in, fan_out), jnp.float32, -bound, bound)
        b = jax.random.uniform(kb, (1, fan_out), jnp.float32, -bound, bound)
        params += [w, b]
    return tuple(params)


def prepare_params(params):
    """One-time (hoisted) shaping: cast MXU weights to bf16, keep w1 whole,
    lay fc3 out as an f32 row vector for the VPU reduction."""
    w1, b1, w2, b2, w3, b3 = params
    return (w1.astype(jnp.bfloat16),                    # [S4+A, 256]
            b1.astype(jnp.float32),                     # [1, 256]
            w2.astype(jnp.bfloat16),                    # [256, 256]
            b2.astype(jnp.float32),                     # [1, 256]
            w3.reshape(1, HIDDEN).astype(jnp.float32),  # [1, 256] (VPU path)
            b3.reshape(1, 1).astype(jnp.float32))       # [1, 1]


@functools.partial(jax.jit, static_argnames=("state_dim", "action_dim", "block_batch"))
def q_forward(s, a, prep, state_dim, action_dim, block_batch=1024):
    """Reshape/concat glue in JAX; fused 3-layer MLP in Pallas."""
    S4 = state_dim * 4
    A = action_dim
    IN = S4 + A
    w1, b1, w2, b2, w3_row, b3 = prep

    s2 = s.reshape(-1, S4)
    a2 = a.reshape(-1, A)
    B = s2.shape[0]
    if B == 0:  # degenerate batch
        return jnp.zeros((0, 1), jnp.float32)

    # torch.cat((s, a), -1).  Last dim (IN) stays the full array dim, so the
    # input BlockSpec needs no lane padding.  NOTE: if the upstream producer
    # emits bf16 activations they can be passed straight through (keep TB a
    # multiple of 16); do not add a standalone wrapper cast.
    x2 = jnp.concatenate([s2, a2], axis=-1)                 # [B, IN]

    # Tile selection: small batches run as ONE full-batch tile (no padding,
    # block dims equal full array dims); large batches get >= 2 grid steps so
    # both v7x TensorCores engage, with an 8-aligned tile <= block_batch.
    B8 = _round_up(B, 8)
    if B8 <= 2 * _MIN_TILE:
        TB, Bp = B, B
    else:
        TB = min(block_batch, _round_up(pl.cdiv(B8, 2), 8))
        Bp = _round_up(B, TB)
    if Bp != B:
        # Ragged tail only; fuses with the concat above (single copy).
        x2 = jnp.pad(x2, ((0, Bp - B), (0, 0)))
    grid = (Bp // TB,)

    resident = lambda r, c: pl.BlockSpec((r, c), lambda i: (0, 0))

    flops = 2 * Bp * (IN * HIDDEN + HIDDEN * HIDDEN + HIDDEN)
    bytes_accessed = (
        Bp * IN * x2.dtype.itemsize                 # activations in
        + (w1.size + w2.size) * 2                   # bf16 weights
        + (b1.size + b2.size + w3_row.size + b3.size) * 4
        + grid[0] * OUT_SUBLANES * TB * 4)          # lane-major output slab

    out = pl.pallas_call(
        _q_mlp_kernel,
        out_shape=jax.ShapeDtypeStruct((grid[0], OUT_SUBLANES, TB), jnp.float32),
        grid=grid,
        in_specs=[
            pl.BlockSpec((TB, IN), lambda i: (i, 0)),   # x tile (pipelined)
            resident(w1.shape[0], HIDDEN),              # w1 (bf16, VMEM-resident)
            resident(1, HIDDEN),                        # b1
            resident(HIDDEN, HIDDEN),                   # w2 (bf16)
            resident(1, HIDDEN),                        # b2
            resident(1, HIDDEN),                        # w3 row (f32)
            resident(1, 1),                             # b3
        ],
        out_specs=pl.BlockSpec((1, OUT_SUBLANES, TB), lambda i: (i, 0, 0)),
        compiler_params=pltpu.CompilerParams(
            dimension_semantics=("parallel",)),
        cost_estimate=pl.CostEstimate(
            flops=flops, transcendentals=0, bytes_accessed=bytes_accessed),
    )(x2, w1, b1, w2, b2, w3_row, b3)

    # Lane-major slab -> [B, 1]: take sublane 0 of each tile and flatten.
    return out[:, 0, :].reshape(-1)[:B, None]


if __name__ == "__main__":
    state_dim = 8
    action_dim = 4
    batch = 8

    key = jax.random.PRNGKey(0)
    k_s, k_a, k_p = jax.random.split(key, 3)

    # s carries 4 stacked state frames, as implied by state_dim * 4.
    s = jax.random.normal(k_s, (batch, 4, state_dim), jnp.float32)
    a = jax.random.normal(k_a, (batch, action_dim), jnp.float32)

    params = init_params(k_p, state_dim, action_dim)
    prep = prepare_params(params)  # hoisted, done once

    q = q_forward(s, a, prep, state_dim, action_dim)
    jax.block_until_ready(q)
    assert q.shape == (batch, 1)

    # Reference 1: mirror the kernel's bf16-weight numerics (tight tolerance).
    s2 = s.reshape(-1, state_dim * 4)
    a2 = a.reshape(-1, action_dim)
    x2 = jnp.concatenate([s2, a2], axis=-1)
    w1, b1, w2, b2, w3_row, b3 = prep
    h1 = jnp.maximum(
        jnp.dot(x2.astype(jnp.bfloat16), w1, preferred_element_type=jnp.float32)
        + b1, 0.0)
    h2 = jnp.maximum(
        jnp.dot(h1.astype(jnp.bfloat16), w2, preferred_element_type=jnp.float32)
        + b2, 0.0)
    ref_bf16 = jnp.sum(h2 * w3_row, axis=-1, keepdims=True) + b3
    assert jnp.allclose(q, ref_bf16, atol=2e-3, rtol=2e-3)

    # Reference 2: original f32 PyTorch semantics (loose tolerance for bf16 weights).
    w1f, b1f, w2f, b2f, w3f, b3f = params
    ref_f32 = jnp.maximum(x2 @ w1f + b1f, 0.0)
    ref_f32 = jnp.maximum(ref_f32 @ w2f + b2f, 0.0)
    ref_f32 = ref_f32 @ w3f + b3f
    assert jnp.allclose(q, ref_f32, atol=5e-2, rtol=5e-2)

    print("KERNEL_OK")
</pallas_src>

<mosaic_0001>
module attributes {stable_mosaic.version = 11 : i64} {
  func.func @_q_mlp_kernel(%arg0: i32, %arg1: memref<8x36xf32, #tpu.memory_space<vmem>>, %arg2: memref<36x256xbf16, #tpu.memory_space<vmem>>, %arg3: memref<1x256xf32, #tpu.memory_space<vmem>>, %arg4: memref<256x256xbf16, #tpu.memory_space<vmem>>, %arg5: memref<1x256xf32, #tpu.memory_space<vmem>>, %arg6: memref<1x256xf32, #tpu.memory_space<vmem>>, %arg7: memref<1x1xf32, #tpu.memory_space<vmem>>, %arg8: memref<1x8x8xf32, #tpu.memory_space<vmem>>) attributes {dimension_semantics = [#tpu.dimension_semantics<parallel>], iteration_bounds = array<i64: 1>, scalar_prefetch = 0 : i64, scratch_operands = 0 : i64, tpu.core_type = #tpu.core_type<tc>, window_params = [{transform_indices = @transform_0, window_bounds = array<i64: 8, 36>}, {pipeline_mode = #tpu.pipeline_mode<synchronous>, transform_indices = @transform_1, window_bounds = array<i64: 36, 256>}, {pipeline_mode = #tpu.pipeline_mode<synchronous>, transform_indices = @transform_2, window_bounds = array<i64: 1, 256>}, {pipeline_mode = #tpu.pipeline_mode<synchronous>, transform_indices = @transform_3, window_bounds = array<i64: 256, 256>}, {pipeline_mode = #tpu.pipeline_mode<synchronous>, transform_indices = @transform_4, window_bounds = array<i64: 1, 256>}, {pipeline_mode = #tpu.pipeline_mode<synchronous>, transform_indices = @transform_5, window_bounds = array<i64: 1, 256>}, {pipeline_mode = #tpu.pipeline_mode<synchronous>, transform_indices = @transform_6, window_bounds = array<i64: 1, 1>}, {transform_indices = @transform_7, window_bounds = array<i64: 1, 8, 8>}]} {
    %c0 = arith.constant 0 : index
    %c0_0 = arith.constant 0 : index
    %0 = vector.load %arg1[%c0, %c0_0] : memref<8x36xf32, #tpu.memory_space<vmem>>, vector<8x36xf32>
    %1 = arith.truncf %0 : vector<8x36xf32> to vector<8x36xbf16>
    %c0_1 = arith.constant 0 : index
    %c0_2 = arith.constant 0 : index
    %2 = vector.load %arg2[%c0_1, %c0_2] : memref<36x256xbf16, #tpu.memory_space<vmem>>, vector<36x256xbf16>
    %cst = arith.constant dense<0.000000e+00> : vector<8x256xf32>
    %3 = tpu.matmul %1, %2, %cst {dimension_numbers = #tpu.dot_dimension_numbers<[1], [0], [0], [1], [0, 0, 1, 1], [], []>} : vector<8x36xbf16>, vector<36x256xbf16>, vector<8x256xf32> -> vector<8x256xf32>
    %c0_3 = arith.constant 0 : index
    %c0_4 = arith.constant 0 : index
    %4 = vector.load %arg3[%c0_3, %c0_4] : memref<1x256xf32, #tpu.memory_space<vmem>>, vector<1x256xf32>
    %5 = vector.broadcast %4 : vector<1x256xf32> to vector<8x256xf32>
    %6 = arith.addf %3, %5 : vector<8x256xf32>
    %cst_5 = arith.constant 0.000000e+00 : f32
    %7 = vector.broadcast %cst_5 : f32 to vector<8x256xf32>
    %8 = arith.maximumf %6, %7 : vector<8x256xf32>
    %9 = arith.truncf %8 : vector<8x256xf32> to vector<8x256xbf16>
    %c0_6 = arith.constant 0 : index
    %c0_7 = arith.constant 0 : index
    %10 = vector.load %arg4[%c0_6, %c0_7] : memref<256x256xbf16, #tpu.memory_space<vmem>>, vector<256x256xbf16>
    %cst_8 = arith.constant dense<0.000000e+00> : vector<8x256xf32>
    %11 = tpu.matmul %9, %10, %cst_8 {dimension_numbers = #tpu.dot_dimension_numbers<[1], [0], [0], [1], [0, 0, 1, 1], [], []>} : vector<8x256xbf16>, vector<256x256xbf16>, vector<8x256xf32> -> vector<8x256xf32>
    %c0_9 = arith.constant 0 : index
    %c0_10 = arith.constant 0 : index
    %12 = vector.load %arg5[%c0_9, %c0_10] : memref<1x256xf32, #tpu.memory_space<vmem>>, vector<1x256xf32>
    %13 = vector.broadcast %12 : vector<1x256xf32> to vector<8x256xf32>
    %14 = arith.addf %11, %13 : vector<8x256xf32>
    %cst_11 = arith.constant 0.000000e+00 : f32
    %15 = vector.broadcast %cst_11 : f32 to vector<8x256xf32>
    %16 = arith.maximumf %14, %15 : vector<8x256xf32>
    %c0_12 = arith.constant 0 : index
    %c0_13 = arith.constant 0 : index
    %17 = vector.load %arg6[%c0_12, %c0_13] : memref<1x256xf32, #tpu.memory_space<vmem>>, vector<1x256xf32>
    %18 = vector.broadcast %17 : vector<1x256xf32> to vector<8x256xf32>
    %19 = arith.mulf %16, %18 : vector<8x256xf32>
    %cst_14 = arith.constant dense<0.000000e+00> : vector<8xf32>
    %20 = vector.multi_reduction <add>, %19, %cst_14 [1] : vector<8x256xf32> to vector<8xf32>
    %21 = vector.shape_cast %20 : vector<8xf32> to vector<8x1xf32>
    %22 = tpu.transpose %21, [1, 0] : vector<8x1xf32> -> vector<1x8xf32>
    %c0_15 = arith.constant 0 : index
    %c0_16 = arith.constant 0 : index
    %23 = vector.load %arg7[%c0_15, %c0_16] : memref<1x1xf32, #tpu.memory_space<vmem>>, vector<1x1xf32>
    %24 = vector.broadcast %23 : vector<1x1xf32> to vector<1x8xf32>
    %25 = arith.addf %22, %24 : vector<1x8xf32>
    %26 = vector.shape_cast %25 : vector<1x8xf32> to vector<1x1x8xf32>
    %27 = vector.shape_cast %26 : vector<1x1x8xf32> to vector<1x1x8xf32>
    %28 = vector.broadcast %27 : vector<1x1x8xf32> to vector<1x8x8xf32>
    %c0_17 = arith.constant 0 : index
    %c0_18 = arith.constant 0 : index
    %c0_19 = arith.constant 0 : index
    %29 = vector.load %arg8[%c0_17, %c0_18, %c0_19] : memref<1x8x8xf32, #tpu.memory_space<vmem>>, vector<1x8x8xf32>
    tpu.vector_store %arg8[%c0_17, %c0_18, %c0_19], %28 {strides = array<i32>} : memref<1x8x8xf32, #tpu.memory_space<vmem>>, vector<1x8x8xf32>,
    return
  }
  func.func @transform_0(%arg0: i32) -> (i32, i32) {
    %c0_i32 = arith.constant 0 : i32
    %c0_i32_0 = arith.constant 0 : i32
    return %arg0, %c0_i32 : i32, i32
  }
  func.func @transform_1(%arg0: i32) -> (i32, i32) {
    %c0_i32 = arith.constant 0 : i32
    %c0_i32_0 = arith.constant 0 : i32
    %c0_i32_1 = arith.constant 0 : i32
    return %c0_i32, %c0_i32_0 : i32, i32
  }
  func.func @transform_2(%arg0: i32) -> (i32, i32) {
    %c0_i32 = arith.constant 0 : i32
    %c0_i32_0 = arith.constant 0 : i32
    %c0_i32_1 = arith.constant 0 : i32
    return %c0_i32, %c0_i32_0 : i32, i32
  }
  func.func @transform_3(%arg0: i32) -> (i32, i32) {
    %c0_i32 = arith.constant 0 : i32
    %c0_i32_0 = arith.constant 0 : i32
    %c0_i32_1 = arith.constant 0 : i32
    return %c0_i32, %c0_i32_0 : i32, i32
  }
  func.func @transform_4(%arg0: i32) -> (i32, i32) {
    %c0_i32 = arith.constant 0 : i32
    %c0_i32_0 = arith.constant 0 : i32
    %c0_i32_1 = arith.constant 0 : i32
    return %c0_i32, %c0_i32_0 : i32, i32
  }
  func.func @transform_5(%arg0: i32) -> (i32, i32) {
    %c0_i32 = arith.constant 0 : i32
    %c0_i32_0 = arith.constant 0 : i32
    %c0_i32_1 = arith.constant 0 : i32
    return %c0_i32, %c0_i32_0 : i32, i32
  }
  func.func @transform_6(%arg0: i32) -> (i32, i32) {
    %c0_i32 = arith.constant 0 : i32
    %c0_i32_0 = arith.constant 0 : i32
    %c0_i32_1 = arith.constant 0 : i32
    return %c0_i32, %c0_i32_0 : i32, i32
  }
  func.func @transform_7(%arg0: i32) -> (i32, i32, i32) {
    %c0_i32 = arith.constant 0 : i32
    %c0_i32_0 = arith.constant 0 : i32
    %c0_i32_1 = arith.constant 0 : i32
    return %arg0, %c0_i32, %c0_i32_0 : i32, i32, i32
  }
}

</mosaic_0001>

<bundles_post_ra>
// kernel: q_forward.1
= control target key start
LH: loop header
LB: loop body
LE: loop exit
PB: predicated region body
PF: predicated region fallthrough
CT: control target
= control target key end

     0   :  { %s665_s0 = inlined_call_operand.vmem [shape: f32[8,36], index: 0, kind: input, shape index: {}]   ;;  %s666_s1 = inlined_call_operand.vmem [shape: bf16[36,256], index: 1, kind: input, shape index: {}]   ;;  %s667_s2 = inlined_call_operand.vmem [shape: f32[1,256], index: 2, kind: input, shape index: {}]   ;;  %s668_s3 = inlined_call_operand.hbm [shape: bf16[256,256], index: 3, kind: input, shape index: {}]   ;;  %s669_s4 = inlined_call_operand.vmem [shape: f32[1,256], index: 4, kind: input, shape index: {}]   ;;  %s670_s5 = inlined_call_operand.vmem [shape: f32[1,256], index: 5, kind: input, shape index: {}]   ;;  %s671_s6 = inlined_call_operand.<no memory space> [shape: f32[1,1], index: 6, kind: input, shape index: {}]   ;;  %s672_s7 = inlined_call_operand.vmem [shape: f32[1,8,8], index: 7, kind: output, shape index: {}]  }
   0x1   :  { %v12_v0 = vstv %s671_s6 }
   0x2   :  { %13 = vst [vmem:[#allocation2] sm:$0x1] %v12_v0 }
   0x3   :  { %14 = vsyncpa [#allocation4], 0  ;;  %s585_s26 = smov [#allocation3]  }
   0x4   :  { %s26_s27 = sshll.u32 %s585_s26, 4  ;;  %s27_s27 = int_to_ptr.vmem [resolvable:$true] %s26_s27 }
   0x5   :  { %s571_s28 = scalar_lea.vmem %s27_s27, 4096  ;;  %p576_p1 = scmp.lt.s32.totalorder %s27_s27, %s27_s27 }
   0x6   :  { %p572_p0 = scmp.ne.s32.totalorder %s27_s27, %s571_s28  ;;  %p577_p2 = scmp.lt.s32.totalorder %s571_s28, %s571_s28 }
   0x8   :  { %p578_p3 = por %p577_p2, %p576_p1 }
   0xa   :  { %p579_p4 = pnand %p578_p3, %p572_p0 }
   0xc   :  { %582 = shalt.err (!%p579_p4)
}
   0xd   :  { %s586_s29 = smov 128   ;;  %s587_s30 = smov 8  }
   0xe   :  { %32 = dma.hbm_to_vmem [thread:$0]  %s668_s3, 4096, %s27_s27, [#allocation4], %s586_s29, %s586_s29, %s587_s30  }
   0xf   :  { %583 = dma.done.wait [#allocation4], 4096  }
  0x10   :  { %584 = vsyncadd [#allocation4], 4294963200  ;;  %v588_v1 = vmov 0   ;;  %v49_v2 = vld [vmem:[%s666_s1 + $0x20] sm:$0x33]  ;;  %vm91_vm0 = vcmask 1041408   ;;  %v52_v44 = vlaneseq }
  0x11   :  { %130 = vmatprep.mubr.bf16.mxu0 %v588_v1  ;;  %506 = vset.pattern.permute.xlu0 %v588_v1  ;;  %v466_v3 = vcombine.high %v49_v2, %v49_v2  ;;  %v465_v4 = vcombine.low %v49_v2, %v49_v2  ;;  %v509_v5 = vld [vmem:[%s666_s1 + $0x14] ss:$8 sps:$4 sm:$0xff]   ;;  %v511_v7 = vld [vmem:[%s666_s1 + $0x10] ss:$8 sps:$4 sm:$0xff]   ;;  %v512_v10 = vld [vmem:[%s666_s1 + $0x4] ss:$8 sps:$4 sm:$0xff]  }
  0x12   :  { %v515_v8 = vld [vmem:[#allocation3 + $0x74] ss:$8 sps:$4 sm:$0xff]   ;;  %v517_v9 = vld [vmem:[#allocation3 + $0x70] ss:$8 sps:$4 sm:$0xff]   ;;  %v518_v11 = vld [vmem:[#allocation3 + $0x64] ss:$8 sps:$4 sm:$0xff]  }
  0x13   :  { %467 = vmatprep.subr.msk.bf16.mxu0 %vm91_vm0, %v466_v3  ;;  %v93_v6 = vsel %vm91_vm0, %v465_v4, 0  ;;  %v514_v12 = vld [vmem:[%s666_s1] ss:$8 sps:$4 sm:$0xff]   ;;  %347 = vmatprep.subr.bf16.mxu1 %v515_v8  ;;  %v523_v17 = vld [vmem:[#allocation3 + $0x50] ss:$8 sps:$4 sm:$0xff]   ;;  %vm87_vm1 = vcmask 293888  }
  0x14   :  { %109 = vmatpush1.bf16.msra.mxu0 %v93_v6  ;;  %348 = vmatpush1.bf16.msra.mxu1 %v517_v9  ;;  %v520_v13 = vld [vmem:[#allocation3 + $0x60] ss:$8 sps:$4 sm:$0xff]   ;;  %v521_v15 = vld [vmem:[#allocation3 + $0x54] ss:$8 sps:$4 sm:$0xff]   ;;  %v524_v18 = vld [vmem:[#allocation3 + $0x44] ss:$8 sps:$4 sm:$0xff]  }
  0x15   :  { %110 = vmatprep.subr.bf16.mxu0 %v509_v5  ;;  %v43_v14 = vld [vmem:[%s665_s0] sm:$0xff]  ;;  %349 = vmatprep.subr.bf16.mxu1 %v518_v11  ;;  %v529_v21 = vld [vmem:[#allocation3 + $0x30] ss:$8 sps:$4 sm:$0xff]   ;;  %v53_v45 = vshrl.u32 %v52_v44, 7  ;;  %vm454_vm2 = vcmask 64512  }
  0x16   :  { %v44_v16 = vpack.c.bf16 %v43_v14, %v43_v14  ;;  %v526_v19 = vld [vmem:[#allocation3 + $0x40] ss:$8 sps:$4 sm:$0xff]   ;;  %v527_v20 = vld [vmem:[#allocation3 + $0x34] ss:$8 sps:$4 sm:$0xff]   ;;  %v530_v22 = vld [vmem:[#allocation3 + $0x24] ss:$8 sps:$4 sm:$0xff]  }
  0x17   :  { %v532_v23 = vld [vmem:[#allocation3 + $0x20] ss:$8 sps:$4 sm:$0xff]   ;;  %v533_v24 = vld [vmem:[#allocation3 + $0x14] ss:$8 sps:$4 sm:$0xff]   ;;  %v535_v25 = vld [vmem:[#allocation3 + $0x10] ss:$8 sps:$4 sm:$0xff]  }
  0x18   :  { %111 = vmatpush1.bf16.msra.mxu0 %v511_v7  ;;  %350 = vmatpush1.bf16.msra.mxu1 %v520_v13  ;;  %v536_v26 = vld [vmem:[#allocation3 + $0x4] ss:$8 sps:$4 sm:$0xff]   ;;  %v538_v27 = vld [vmem:[#allocation3] ss:$8 sps:$4 sm:$0xff]   ;;  %v539_v28 = vld [vmem:[#allocation3 + $0xf4] ss:$8 sps:$4 sm:$0xff]  }
  0x19   :  { %112 = vmatprep.subr.bf16.mxu0 %v512_v10  ;;  %351 = vmatprep.subr.bf16.mxu1 %v521_v15  ;;  %v541_v29 = vld [vmem:[#allocation3 + $0xf0] ss:$8 sps:$4 sm:$0xff]   ;;  %v542_v30 = vld [vmem:[#allocation3 + $0xe4] ss:$8 sps:$4 sm:$0xff]   ;;  %v544_v31 = vld [vmem:[#allocation3 + $0xe0] ss:$8 sps:$4 sm:$0xff]  }
  0x1a   :  { %v545_v32 = vld [vmem:[#allocation3 + $0xd4] ss:$8 sps:$4 sm:$0xff]   ;;  %v547_v33 = vld [vmem:[#allocation3 + $0xd0] ss:$8 sps:$4 sm:$0xff]   ;;  %v548_v34 = vld [vmem:[#allocation3 + $0xc4] ss:$8 sps:$4 sm:$0xff]  }
  0x1b   :  { %v550_v35 = vld [vmem:[#allocation3 + $0xc0] ss:$8 sps:$4 sm:$0xff]   ;;  %v551_v36 = vld [vmem:[#allocation3 + $0xb4] ss:$8 sps:$4 sm:$0xff]   ;;  %v553_v37 = vld [vmem:[#allocation3 + $0xb0] ss:$8 sps:$4 sm:$0xff]  }
  0x1c   :  { %113 = vmatpush1.bf16.msra.mxu0 %v514_v12  ;;  %352 = vmatpush1.bf16.msra.mxu1 %v523_v17  ;;  %v554_v38 = vld [vmem:[#allocation3 + $0xa4] ss:$8 sps:$4 sm:$0xff]   ;;  %v556_v39 = vld [vmem:[#allocation3 + $0xa0] ss:$8 sps:$4 sm:$0xff]   ;;  %v557_v40 = vld [vmem:[#allocation3 + $0x94] ss:$8 sps:$4 sm:$0xff]  }
  0x1d   :  { %353 = vmatprep.subr.bf16.mxu1 %v524_v18  ;;  %v559_v41 = vld [vmem:[#allocation3 + $0x90] ss:$8 sps:$4 sm:$0xff]   ;;  %v560_v42 = vld [vmem:[#allocation3 + $0x84] ss:$8 sps:$4 sm:$0xff]   ;;  %v562_v43 = vld [vmem:[#allocation3 + $0x80] ss:$8 sps:$4 sm:$0xff]  }
  0x1e   :  { %v54_v46 = vsub.s32 0, %v53_v45  ;;  %v50_v47 = vld [vmem:[%s667_s2] sm:$0x3]  ;;  %v58_v48 = vsub.s32 1, %v53_v45 }
  0x1f   :  { %468 = vmatmul.mubr.msk.bf16.vlgmr.msra.gmra.mxu0 %vm87_vm1, %v44_v16  ;;  %v175_v61 = vld [vmem:[%s669_s4] sm:$0x3] }
  0x20   :  { %354 = vmatpush1.bf16.msra.mxu1 %v526_v19  ;;  %v55_v49 = vrot.slane %v50_v47, %v54_v46  ;;  %v59_v50 = vrot.slane %v50_v47, %v58_v48  ;;  %v180_v62 = vrot.slane %v175_v61, %v54_v46  ;;  %v184_v63 = vrot.slane %v175_v61, %v58_v48  ;;  %v390_v1 = vld [vmem:[%s670_s5] sm:$0x3] }
  0x21   :  { %355 = vmatprep.subr.bf16.mxu1 %v527_v20  ;;  %v395_v6 = vrot.slane %v390_v1, %v54_v46  ;;  %v399_v7 = vrot.slane %v390_v1, %v58_v48  ;;  %v439_v14 = vld [vmem:[#allocation2] sm:$0x1] }
  0x24   :  { %356 = vmatpush1.bf16.msra.mxu1 %v529_v21 }
  0x25   :  { %357 = vmatprep.subr.bf16.mxu1 %v530_v22 }
  0x28   :  { %358 = vmatpush1.bf16.msra.mxu1 %v532_v23 }
  0x29   :  { %359 = vmatprep.subr.bf16.mxu1 %v533_v24 }
  0x2c   :  { %360 = vmatpush1.bf16.msra.mxu1 %v535_v25 }
  0x2d   :  { %361 = vmatprep.subr.bf16.mxu1 %v536_v26 }
  0x30   :  { %362 = vmatpush1.bf16.msra.mxu1 %v538_v27 }
  0x31   :  { %363 = vmatprep.subr.bf16.mxu1 %v539_v28 }
  0x34   :  { %364 = vmatpush2.bf16.msra.mxu1 %v541_v29 }
  0x35   :  { %365 = vmatprep.subr.bf16.mxu1 %v542_v30 }
  0x38   :  { %366 = vmatpush2.bf16.msra.mxu1 %v544_v31 }
  0x39   :  { %367 = vmatprep.subr.bf16.mxu1 %v545_v32 }
  0x3c   :  { %368 = vmatpush2.bf16.msra.mxu1 %v547_v33 }
  0x3d   :  { %369 = vmatprep.subr.bf16.mxu1 %v548_v34 }
  0x40   :  { %370 = vmatpush2.bf16.msra.mxu1 %v550_v35 }
  0x41   :  { %371 = vmatprep.subr.bf16.mxu1 %v551_v36 }
  0x44   :  { %372 = vmatpush2.bf16.msra.mxu1 %v553_v37 }
  0x45   :  { %373 = vmatprep.subr.bf16.mxu1 %v554_v38 }
  0x48   :  { %374 = vmatpush2.bf16.msra.mxu1 %v556_v39 }
  0x49   :  { %375 = vmatprep.subr.bf16.mxu1 %v557_v40 }
  0x4c   :  { %376 = vmatpush2.bf16.msra.mxu1 %v559_v41 }
  0x4d   :  { %377 = vmatprep.subr.bf16.mxu1 %v560_v42 }
  0x50   :  { %378 = vmatpush2.bf16.msra.mxu1 %v562_v43 }
  0xdf   :  { %v132_v51 = vpop.f32.mrf.mxu0 }
  0xe0   :  { %v133_v52 = vadd.f32 %v132_v51, %v55_v49 }
  0xe1   :  { %v134_v53 = vpop.f32.mrf.mxu0 }
  0xe2   :  { %v135_v54 = vadd.f32 %v134_v53, %v59_v50  ;;  %v139_v55 = vmax.f32 %v133_v52, 0.0 }
  0xe3   :  { %v136_v56 = vpop.f32.mrf.mxu0 }
  0xe4   :  { %v140_v57 = vmax.f32 %v135_v54, 0.0  ;;  %v141_v60 = vpack.c.bf16 %v139_v55, %v139_v55 }
  0xe5   :  { %v137_v58 = vpop.f32.mrf.mxu0 }
  0xe6   :  { %v142_v59 = vpack.c.bf16 %v140_v57, %v140_v57 }
  0xe8   :  { %379 = vmatprep.mubr.bf16.mxu1 %v142_v59 }
  0xe9   :  { %380 = vmatmul.mubr.bf16.vlgmr.msra.gmra.mxu1 %v141_v60 }
 0x1a9   :  { %v381_v0 = vpop.f32.mrf.mxu1 }
 0x1aa   :  { %v382_v2 = vadd.f32 %v381_v0, %v180_v62 }
 0x1ab   :  { %v383_v3 = vpop.f32.mrf.mxu1 }
 0x1ac   :  { %v388_v4 = vmax.f32 %v382_v2, 0.0  ;;  %v384_v5 = vadd.f32 %v383_v3, %v184_v63 }
 0x1ad   :  { %v385_v8 = vpop.f32.mrf.mxu1 }
 0x1ae   :  { %v389_v9 = vmax.f32 %v384_v5, 0.0  ;;  %v402_v11 = vmul.f32 %v395_v6, %v388_v4 }
 0x1af   :  { %v386_v10 = vpop.f32.mrf.mxu1 }
 0x1b0   :  { %v403_v12 = vmul.f32 %v399_v7, %v389_v9 }
 0x1b2   :  { %v404_v13 = vadd.f32 %v403_v12, %v402_v11 }
 0x1b4   :  { %405 = vadd.xlane.f32.xlu0 %v404_v13 }
 0x1ca   :  { %442 = vperm.xlu0 %506, %v439_v14  }
 0x23d   :  { %v406_v15 = vpop.xlane.xlu0 %405 }
 0x23e   :  { %407 = vxpose.xlu1.b32.start.end [1/1] (short) (narrow) %v406_v15, 8 }
 0x245   :  { %v443_v16 = vpop.permute.xlu0 %442 }
 0x246   :  { %v448_v17 = vrot.slane %v443_v16, %v54_v46 }
 0x2ba   :  { %v423_v18 = vpop.trf.xlu1 }
 0x2bb   :  { %v449_v19 = vadd.f32 %v448_v17, %v423_v18 }
 0x2bd   :  { %v453_v20 = vrot.slane %v449_v19, %v54_v46 }
 0x2bf   :  { %455 = vst.msk [vmem:[%s672_s7] sm:$0xff] %vm454_vm2, %v453_v20 }
 0x2c0   :  { %460 = vsyncpa [#allocation4], 1 }

</bundles_post_ra>
